<compile_context>
chip_gen: v5e
topology: v5e:2x2
jax: 0.10.0
libtpu: 0.0.40
codegen_flags: <defaults>
</compile_context>

<pallas_src>
import functools

import jax
import jax.numpy as jnp
from jax.experimental import pallas as pl
from jax.experimental.pallas import tpu as pltpu

_LANES = 128


@functools.lru_cache(maxsize=1)
def _vmem_capacity_bytes():
    try:
        return int(pltpu.get_tpu_info().vmem_capacity_bytes)
    except Exception:
        return 128 * 1024 * 1024  # assume v5e/v6e-class VMEM if the query fails


def _pick_tiling():
    """Generation-aware (block_rows, vmem_limit_bytes)."""
    if _vmem_capacity_bytes() >= 96 * 1024 * 1024:
        # v5e / v6e: 128 MiB VMEM per TensorCore -> big tiles.
        return 8192, 64 * 1024 * 1024
    # v7x: 64 MiB VMEM per TensorCore -> keep double-buffering comfortable.
    return 4096, 40 * 1024 * 1024


def _loss_kernel(pred_ref, gt_ref, sum_ref, cnt_ref, *,
                 rows_total, block_rows, need_row_mask):
    depth = pred_ref[0, 0, :, :].astype(jnp.float32)          # (S, 128)
    conf = jnp.abs(pred_ref[0, 1, :, :].astype(jnp.float32))  # (S, 128)
    g = gt_ref[0, 0, :, :].astype(jnp.float32)                # (S, 128)

    valid = g > 0.0
    err = depth - g
    val = 0.5 * (err * err * jnp.exp(-conf) + conf)

    def _emit(mask):
        # Select (not multiply) so NaN/Inf in masked-out / garbage pixels can't
        # poison the sum; cross-sublane reduce to a lane-dense (1, 128) partial.
        sum_ref[0, 0, :, :] = jnp.sum(jnp.where(mask, val, 0.0),
                                      axis=0, keepdims=True)
        cnt_ref[0, 0, :, :] = jnp.sum(mask.astype(jnp.float32),
                                      axis=0, keepdims=True)

    if need_row_mask:  # trace-time constant: only when rows % block_rows != 0
        t = pl.program_id(1)
        is_last = t == pl.num_programs(1) - 1

        @pl.when(is_last)
        def _tail():
            local_row = jax.lax.broadcasted_iota(
                jnp.int32, (block_rows, _LANES), 0)
            row_ok = (t * block_rows + local_row) < rows_total
            _emit(jnp.logical_and(valid, row_ok))

        @pl.when(jnp.logical_not(is_last))
        def _body():
            _emit(valid)
    else:
        _emit(valid)


@jax.jit
def mse_loss_uncertainty(prediction, gt):
    """prediction: (N, 2, H, W), gt: (N, 1, H, W). Returns scalar f32 loss."""
    N, C, H, W = prediction.shape
    assert C == 2, "prediction must have 2 channels (depth, confidence)"
    hw = H * W

    pred = prediction.reshape(N, 2, hw)   # free reshape, no channel split
    gt3 = gt.reshape(N, 1, hw)            # free reshape

    if hw % _LANES != 0:
        # TODO(synk): jnp.pad materializes a second HBM copy of both tensors
        # (only hit when H*W % 128 != 0); padded gt == 0 so it's masked out.
        pad = (-hw) % _LANES
        pred = jnp.pad(pred, ((0, 0), (0, 0), (0, pad)))
        gt3 = jnp.pad(gt3, ((0, 0), (0, 0), (0, pad)))
        hw += pad

    rows = hw // _LANES
    pred4 = pred.reshape(N, 2, rows, _LANES)
    gt4 = gt3.reshape(N, 1, rows, _LANES)

    max_block_rows, vmem_limit = _pick_tiling()
    if rows <= max_block_rows:
        block_rows = rows          # full extent: always a legal block dim
        n_tiles = 1
    else:
        block_rows = max_block_rows
        n_tiles = pl.cdiv(rows, block_rows)
    need_row_mask = (rows % block_rows) != 0

    kernel = functools.partial(
        _loss_kernel,
        rows_total=rows,
        block_rows=block_rows,
        need_row_mask=need_row_mask,
    )

    n_px = N * hw
    cost = pl.CostEstimate(
        flops=8 * n_px,
        transcendentals=n_px,
        bytes_accessed=n_px * (2 * prediction.dtype.itemsize
                               + gt.dtype.itemsize)
        + 2 * N * n_tiles * _LANES * 4,
    )

    sums, cnts = pl.pallas_call(
        kernel,
        out_shape=(
            jax.ShapeDtypeStruct((N, n_tiles, 1, _LANES), jnp.float32),
            jax.ShapeDtypeStruct((N, n_tiles, 1, _LANES), jnp.float32),
        ),
        grid_spec=pltpu.PrefetchScalarGridSpec(
            num_scalar_prefetch=0,
            grid=(N, n_tiles),
            in_specs=[
                pl.BlockSpec((1, 2, block_rows, _LANES),
                             lambda n, t: (n, 0, t, 0)),
                pl.BlockSpec((1, 1, block_rows, _LANES),
                             lambda n, t: (n, 0, t, 0)),
            ],
            out_specs=[
                pl.BlockSpec((1, 1, 1, _LANES), lambda n, t: (n, t, 0, 0)),
                pl.BlockSpec((1, 1, 1, _LANES), lambda n, t: (n, t, 0, 0)),
            ],
        ),
        compiler_params=pltpu.CompilerParams(
            dimension_semantics=("parallel", "parallel"),
            vmem_limit_bytes=vmem_limit,
        ),
        cost_estimate=cost,
    )(pred4, gt4)

    # mean over masked elements (matches torch.mean(x[mask]); NaN if mask empty)
    return (jnp.sum(sums) / jnp.sum(cnts)).astype(jnp.float32)


def _reference(prediction, gt):
    mask = gt > 0
    depth = prediction[:, 0:1, :, :]
    conf = jnp.abs(prediction[:, 1:, :, :])
    err = depth - gt
    val = 0.5 * err**2 * jnp.exp(-conf) + 0.5 * conf
    m = mask.astype(jnp.float32)
    return jnp.sum(val * m) / jnp.sum(m)


if __name__ == "__main__":
    key = jax.random.PRNGKey(0)
    k1, k2 = jax.random.split(key)

    N, H, W = 2, 16, 16
    prediction = jax.random.normal(k1, (N, 2, H, W), dtype=jnp.float32)
    # gt with a mix of positive (valid) and non-positive (invalid) pixels
    gt = jax.random.uniform(k2, (N, 1, H, W), minval=-1.0, maxval=2.0,
                            dtype=jnp.float32)

    loss = mse_loss_uncertainty(prediction, gt)
    loss = jax.block_until_ready(loss)

    ref = _reference(prediction, gt)
    assert jnp.allclose(loss, ref, rtol=1e-5, atol=1e-6), (loss, ref)

    print("KERNEL_OK")
</pallas_src>

<mosaic_0001>
module attributes {stable_mosaic.version = 11 : i64} {
  func.func @_loss_kernel(%arg0: i32, %arg1: i32, %arg2: memref<1x2x2x128xf32, #tpu.memory_space<vmem>>, %arg3: memref<1x1x2x128xf32, #tpu.memory_space<vmem>>, %arg4: memref<1x1x1x128xf32, #tpu.memory_space<vmem>>, %arg5: memref<1x1x1x128xf32, #tpu.memory_space<vmem>>) attributes {dimension_semantics = [#tpu.dimension_semantics<parallel>, #tpu.dimension_semantics<parallel>], iteration_bounds = array<i64: 2, 1>, scalar_prefetch = 0 : i64, scratch_operands = 0 : i64, tpu.core_type = #tpu.core_type<tc>, window_params = [{transform_indices = @transform_0, window_bounds = array<i64: 1, 2, 2, 128>}, {transform_indices = @transform_1, window_bounds = array<i64: 1, 1, 2, 128>}, {transform_indices = @transform_2, window_bounds = array<i64: 1, 1, 1, 128>}, {transform_indices = @transform_3, window_bounds = array<i64: 1, 1, 1, 128>}]} {
    %c0 = arith.constant 0 : index
    %c0_0 = arith.constant 0 : index
    %c0_1 = arith.constant 0 : index
    %c0_2 = arith.constant 0 : index
    %0 = vector.load %arg2[%c0, %c0_0, %c0_1, %c0_2] : memref<1x2x2x128xf32, #tpu.memory_space<vmem>>, vector<1x1x2x128xf32>
    %1 = vector.shape_cast %0 : vector<1x1x2x128xf32> to vector<2x128xf32>
    %c0_3 = arith.constant 0 : index
    %c1 = arith.constant 1 : index
    %c0_4 = arith.constant 0 : index
    %c0_5 = arith.constant 0 : index
    %2 = vector.load %arg2[%c0_3, %c1, %c0_4, %c0_5] : memref<1x2x2x128xf32, #tpu.memory_space<vmem>>, vector<1x1x2x128xf32>
    %3 = vector.shape_cast %2 : vector<1x1x2x128xf32> to vector<2x128xf32>
    %4 = math.absf %3 : vector<2x128xf32>
    %c0_6 = arith.constant 0 : index
    %c0_7 = arith.constant 0 : index
    %c0_8 = arith.constant 0 : index
    %c0_9 = arith.constant 0 : index
    %5 = vector.load %arg3[%c0_6, %c0_7, %c0_8, %c0_9] : memref<1x1x2x128xf32, #tpu.memory_space<vmem>>, vector<1x1x2x128xf32>
    %6 = vector.shape_cast %5 : vector<1x1x2x128xf32> to vector<2x128xf32>
    %cst = arith.constant 0.000000e+00 : f32
    %7 = vector.broadcast %cst : f32 to vector<2x128xf32>
    %8 = arith.cmpf ogt, %6, %7 : vector<2x128xf32>
    %9 = arith.subf %1, %6 : vector<2x128xf32>
    %10 = arith.mulf %9, %9 : vector<2x128xf32>
    %cst_10 = arith.constant 0.000000e+00 : f32
    %11 = vector.broadcast %cst_10 : f32 to vector<2x128xf32>
    %12 = arith.subf %11, %4 : vector<2x128xf32>
    %13 = math.exp %12 : vector<2x128xf32>
    %14 = arith.mulf %10, %13 : vector<2x128xf32>
    %15 = arith.addf %14, %4 : vector<2x128xf32>
    %cst_11 = arith.constant 5.000000e-01 : f32
    %16 = vector.broadcast %cst_11 : f32 to vector<2x128xf32>
    %17 = arith.mulf %16, %15 : vector<2x128xf32>
    %cst_12 = arith.constant 0.000000e+00 : f32
    %18 = vector.broadcast %cst_12 : f32 to vector<2x128xf32>
    %19 = arith.select %8, %17, %18 : vector<2x128xi1>, vector<2x128xf32>
    %cst_13 = arith.constant dense<0.000000e+00> : vector<128xf32>
    %20 = vector.multi_reduction <add>, %19, %cst_13 [0] : vector<2x128xf32> to vector<128xf32>
    %21 = vector.shape_cast %20 : vector<128xf32> to vector<1x128xf32>
    %c0_14 = arith.constant 0 : index
    %c0_15 = arith.constant 0 : index
    %c0_16 = arith.constant 0 : index
    %c0_17 = arith.constant 0 : index
    %22 = vector.load %arg4[%c0_14, %c0_15, %c0_16, %c0_17] : memref<1x1x1x128xf32, #tpu.memory_space<vmem>>, vector<1x1x1x128xf32>
    %23 = vector.shape_cast %22 : vector<1x1x1x128xf32> to vector<1x128xf32>
    %24 = vector.shape_cast %21 : vector<1x128xf32> to vector<1x1x1x128xf32>
    tpu.vector_store %arg4[%c0_14, %c0_15, %c0_16, %c0_17], %24 {strides = array<i32>} : memref<1x1x1x128xf32, #tpu.memory_space<vmem>>, vector<1x1x1x128xf32>,
    %25 = arith.extui %8 : vector<2x128xi1> to vector<2x128xi32>
    %26 = arith.sitofp %25 : vector<2x128xi32> to vector<2x128xf32>
    %cst_18 = arith.constant dense<0.000000e+00> : vector<128xf32>
    %27 = vector.multi_reduction <add>, %26, %cst_18 [0] : vector<2x128xf32> to vector<128xf32>
    %28 = vector.shape_cast %27 : vector<128xf32> to vector<1x128xf32>
    %c0_19 = arith.constant 0 : index
    %c0_20 = arith.constant 0 : index
    %c0_21 = arith.constant 0 : index
    %c0_22 = arith.constant 0 : index
    %29 = vector.load %arg5[%c0_19, %c0_20, %c0_21, %c0_22] : memref<1x1x1x128xf32, #tpu.memory_space<vmem>>, vector<1x1x1x128xf32>
    %30 = vector.shape_cast %29 : vector<1x1x1x128xf32> to vector<1x128xf32>
    %31 = vector.shape_cast %28 : vector<1x128xf32> to vector<1x1x1x128xf32>
    tpu.vector_store %arg5[%c0_19, %c0_20, %c0_21, %c0_22], %31 {strides = array<i32>} : memref<1x1x1x128xf32, #tpu.memory_space<vmem>>, vector<1x1x1x128xf32>,
    return
  }
  func.func @transform_0(%arg0: i32, %arg1: i32) -> (i32, i32, i32, i32) {
    %c0_i32 = arith.constant 0 : i32
    %c0_i32_0 = arith.constant 0 : i32
    %c0_i32_1 = arith.constant 0 : i32
    return %arg0, %c0_i32, %arg1, %c0_i32_0 : i32, i32, i32, i32
  }
  func.func @transform_1(%arg0: i32, %arg1: i32) -> (i32, i32, i32, i32) {
    %c0_i32 = arith.constant 0 : i32
    %c0_i32_0 = arith.constant 0 : i32
    %c0_i32_1 = arith.constant 0 : i32
    return %arg0, %c0_i32, %arg1, %c0_i32_0 : i32, i32, i32, i32
  }
  func.func @transform_2(%arg0: i32, %arg1: i32) -> (i32, i32, i32, i32) {
    %c0_i32 = arith.constant 0 : i32
    %c0_i32_0 = arith.constant 0 : i32
    %c0_i32_1 = arith.constant 0 : i32
    return %arg0, %arg1, %c0_i32, %c0_i32_0 : i32, i32, i32, i32
  }
  func.func @transform_3(%arg0: i32, %arg1: i32) -> (i32, i32, i32, i32) {
    %c0_i32 = arith.constant 0 : i32
    %c0_i32_0 = arith.constant 0 : i32
    %c0_i32_1 = arith.constant 0 : i32
    return %arg0, %arg1, %c0_i32, %c0_i32_0 : i32, i32, i32, i32
  }
}

</mosaic_0001>

<bundles_post_ra>
// kernel: mse_loss_uncertainty.1
= control target key start
LH: loop header
LB: loop body
LE: loop exit
PB: predicated region body
PF: predicated region fallthrough
CT: control target
= control target key end

     0   :  { %s483_s12 = smov 0   ;;  %s485_s13 = smov 0   ;;  %s532_s0 = inlined_call_operand.vmem [shape: f32[2,2,2,128], index: 0, kind: input, shape index: {}]   ;;  %s533_s1 = inlined_call_operand.vmem [shape: f32[2,1,2,128], index: 1, kind: input, shape index: {}]   ;;  %s534_s2 = inlined_call_operand.vmem [shape: f32[2,1,1,128], index: 2, kind: output, shape index: {0}]   ;;  %s535_s3 = inlined_call_operand.vmem [shape: f32[2,1,1,128], index: 3, kind: output, shape index: {1}]  }
   0x1   :  { %s487_s14 = smov 0  }
   0x2 LB: > { %s26_s15 = sadd.s32 1, %s456_s13  ;;  %p402_p0 = scmp.ge.s32.totalorder %s460_s14, 1  ;;  %s460_s14 = sphi %s487_s14, %s14_s14   ;;  %s456_s13 = sphi %s485_s13, %s537_s13   ;;  %s452_s12 = sphi %s483_s12, %s536_s12  }
   0x3   : > { %p28_p1 = scmp.ge.s32.totalorder %s26_s15, 2  ;;  %p175_p2 = scmp.lt.s32.totalorder %s460_s14, 3 }
   0x5   : > { %s539_s15 = smov (%p28_p1, %s26_s15), 0  ;;  %p176_p3 = pnand %p402_p0, %p175_p2 }
   0x6   : > { %p216_p4 = scmp.lt.s32.totalorder (!%p176_p3), %s452_s12, 1 }
   0x7   : > { %179 = sbr.rel (%p176_p3) target bundleno = 50 (0x32), region = 28 }
   0xc   : > { %s541_s12 = smov (!%p216_p4, %s452_s12), 1  ;;  %vm258_vm0 = vcmask 1041408   ;;  %v462_v3 = vmov 0.0  }
   0xd   : > { %s410_s16 = sshll.u32 %s541_s12, 2  ;;  %s405_s17 = sshll.u32 %s541_s12, 1 }
   0xe   : > { %s223_s20 = scalar_lea.vmem %s532_s0, %s410_s16  ;;  %s230_s23 = scalar_lea.vmem %s533_s1, %s405_s17 }
   0xf   : > { %v406_v0 = vld [vmem:[%s223_s20 + $0x2] sm:$0x3]  ;;  %v247_v1 = vld [vmem:[%s230_s23] sm:$0x3]  ;;  %s242_s26 = scalar_lea.vmem %s535_s3, %s541_s12  ;;  %s236_s29 = scalar_lea.vmem %s534_s2, %s541_s12 }
  0x10   : > { %v246_v2 = vand.u32 2147483647, %v406_v0  ;;  %vm248_vm1 = vcmp.gt.f32.partialorder %v247_v1, 0.0  ;;  %v243_v5 = vld [vmem:[%s223_s20] sm:$0x3] }
  0x11   : > { %v407_v4 = vsel %vm248_vm1, 1.0, %v462_v3  ;;  %v249_v10 = vsub.f32 %v243_v5, %v247_v1 }
  0x12   : > { %v251_v6 = vsub.f32 0.0, %v246_v2  ;;  %v269_v7 = vsel %vm258_vm0, %v407_v4, 0.0 }
  0x13   : > { %v270_v8 = vrot.slane %v269_v7, 4  ;;  %v250_v13 = vmul.f32 %v249_v10, %v249_v10 }
  0x14   : > { %v252_v9 = vmul.f32 1.442695, %v251_v6 }
  0x15   : > { %v271_v11 = vadd.f32 %v270_v8, %v269_v7 }
  0x16   : > { %436 = vpow2.f32 %v252_v9 }
  0x17   : > { %v272_v12 = vrot.slane %v271_v11, 2 }
  0x19   : > { %v273_v14 = vadd.f32 %v272_v12, %v271_v11 }
  0x1b   : > { %v274_v15 = vrot.slane %v273_v14, 1 }
  0x1c   : > { %v437_v16 = vpop.eup %436 }
  0x1d   : > { %v254_v17 = vmul.f32 %v437_v16, %v250_v13  ;;  %v275_v18 = vadd.f32 %v274_v15, %v273_v14 }
  0x1f   : > { %v255_v19 = vadd.f32 %v254_v17, %v246_v2  ;;  %276 = vst [vmem:[%s242_s26] sm:$0x1] %v275_v18 }
  0x21   : > { %v256_v20 = vmul.f32 0.5, %v255_v19 }
  0x23   : > { %v257_v21 = vsel %vm248_vm1, %v256_v20, 0.0 }
  0x24   : > { %v259_v22 = vsel %vm258_vm0, %v257_v21, 0.0 }
  0x25   : > { %v260_v23 = vrot.slane %v259_v22, 4 }
  0x27   : > { %v261_v24 = vadd.f32 %v260_v23, %v259_v22 }
  0x29   : > { %v262_v25 = vrot.slane %v261_v24, 2 }
  0x2b   : > { %v263_v26 = vadd.f32 %v262_v25, %v261_v24 }
  0x2d   : > { %v264_v27 = vrot.slane %v263_v26, 1 }
  0x2f   : > { %v265_v28 = vadd.f32 %v264_v27, %v263_v26 }
  0x31   : > { %266 = vst [vmem:[%s236_s29] sm:$0x1] %v265_v28 }
  0x32 PF: > { %s14_s14 = sadd.s32 1, %s460_s14   ;;  %s536_s12 = smov %s456_s13 }
  0x33   : > { %p11_p5 = scmp.ge.s32.totalorder %s14_s14, 4   ;;  %s537_s13 = smov %s539_s15 }
  0x35   :  { %13 = sbr.rel (!%p11_p5) target bundleno = 2 (0x2), region = 74 }

</bundles_post_ra>
